<compile_context>
chip_gen: v6e
topology: v6e:2x2x1
jax: 0.10.0
libtpu: 0.0.40
codegen_flags: <defaults>
</compile_context>

<pallas_src>
import jax
import jax.numpy as jnp
from jax.experimental import pallas as pl
from jax.experimental.pallas import tpu as pltpu

HIDDEN = 50          # logical hidden width of the PyTorch module
HPAD = 128           # lane-aligned padded hidden width


def _round_up(n, m):
    return ((n + m - 1) // m) * m


def _pad2(a, rows, cols):
    r, c = a.shape
    return jnp.pad(a, ((0, rows - r), (0, cols - c)))


def _mlp_kernel(x_ref, w1_ref, b1_ref, w2_ref, b2_ref,
                w3_ref, b3_ref, w4r_ref, b4_ref, o_ref):
    # Cast x f32 -> bf16 on the VPU (saves a full extra HBM pass vs. casting in the wrapper).
    x = x_ref[...].astype(jnp.bfloat16)
    # fc1 (bf16 MXU, f32 accumulation) + bias + relu
    h = jnp.dot(x, w1_ref[...], preferred_element_type=jnp.float32)
    h = jnp.maximum(h + b1_ref[...], 0.0)
    # fc2 + relu (f32; tiny)
    h = jnp.dot(h, w2_ref[...], preferred_element_type=jnp.float32)
    h = jnp.maximum(h + b2_ref[...], 0.0)
    # fc3 + relu
    h = jnp.dot(h, w3_ref[...], preferred_element_type=jnp.float32)
    h = jnp.maximum(h + b3_ref[...], 0.0)
    # fc4: output width 1 -> VPU multiply + XLU lane reduction (keep off the MXU)
    o_ref[...] = jnp.sum(h * w4r_ref[...], axis=-1, keepdims=True) + b4_ref[...]


def essay_scorer_head(x, params, *, block_b=1024):
    """x: (B, 1024) float32, params: dict of weights/biases. Returns (B, 1) float32."""
    B, D = x.shape
    assert D == 1024, D

    w1, b1 = params["w1"], params["b1"]
    w2, b2 = params["w2"], params["b2"]
    w3, b3 = params["w3"], params["b3"]
    w4, b4 = params["w4"], params["b4"]

    # Zero-pad hidden width 50 -> 128 so all weight/activation tiles are lane-dense.
    # (Padded columns stay exactly zero through bias+ReLU, so numerics are unchanged.)
    w1p = _pad2(w1, 1024, HPAD).astype(jnp.bfloat16)   # bf16 weight for the big matmul
    b1p = _pad2(b1, 1, HPAD)
    w2p = _pad2(w2, HPAD, HPAD)
    b2p = _pad2(b2, 1, HPAD)
    w3p = _pad2(w3, HPAD, HPAD)
    b3p = _pad2(b3, 1, HPAD)
    w4r = _pad2(w4.T, 1, HPAD)                          # (1, HPAD) broadcast row
    # b4 stays (1, 1)

    # Batch tile: multiple of 8 sublanes, no larger than the (padded) batch.
    tb = max(8, min(_round_up(block_b, 8), _round_up(B, 8)))
    b_pad = _round_up(B, tb)
    x_in = x
    if b_pad != B:
        x_in = jnp.pad(x_in, ((0, b_pad - B), (0, 0)))
    grid = (pl.cdiv(b_pad, tb),)

    def const2d(a):
        # full-array block, same block every grid step -> stays VMEM-resident
        return pl.BlockSpec(a.shape, lambda i: (0, 0))

    weights = (w1p, b1p, w2p, b2p, w3p, b3p, w4r, b4)
    weight_bytes = sum(int(a.size) * a.dtype.itemsize for a in weights)
    x_itemsize = x_in.dtype.itemsize
    flops = 2 * B * (1024 * HIDDEN + HIDDEN * HIDDEN + HIDDEN * HIDDEN + HIDDEN * 1)
    bytes_accessed = B * 1024 * x_itemsize + B * 4 + weight_bytes

    # 2x-buffered x/out tiles + resident weights + intermediates/slack;
    # never below the 32 MiB scoped-VMEM default.
    needed = 2 * (tb * 1024 * x_itemsize + tb * 4) + weight_bytes \
        + 2 * tb * HPAD * 4 + (4 << 20)
    vmem_limit = int(min(100 << 20, max(32 << 20, needed)))

    out = pl.pallas_call(
        _mlp_kernel,
        out_shape=jax.ShapeDtypeStruct((b_pad, 1), jnp.float32),
        grid=grid,
        in_specs=[
            pl.BlockSpec((tb, 1024), lambda i: (i, 0)),   # only x is re-DMA'd per step
            const2d(w1p), const2d(b1p),
            const2d(w2p), const2d(b2p),
            const2d(w3p), const2d(b3p),
            const2d(w4r), const2d(b4),
        ],
        out_specs=pl.BlockSpec((tb, 1), lambda i: (i, 0)),
        compiler_params=pltpu.CompilerParams(
            dimension_semantics=("parallel",),
            vmem_limit_bytes=vmem_limit),
        cost_estimate=pl.CostEstimate(
            flops=flops, transcendentals=0, bytes_accessed=bytes_accessed),
    )(x_in, *weights)

    return out[:B]


def init_params(key):
    """Deterministic init matching the PyTorch module's shapes.
    Weights stored (in, out); biases stored (1, out) for clean 2-D broadcasting."""
    dims = [(1024, 50), (50, 50), (50, 50), (50, 1)]
    params = {}
    for i, (fan_in, fan_out) in enumerate(dims, start=1):
        key, kw, kb = jax.random.split(key, 3)
        bound = 1.0 / jnp.sqrt(fan_in)  # same scale as torch default Linear init
        params[f"w{i}"] = jax.random.uniform(
            kw, (fan_in, fan_out), jnp.float32, minval=-bound, maxval=bound)
        params[f"b{i}"] = jax.random.uniform(
            kb, (1, fan_out), jnp.float32, minval=-bound, maxval=bound)
    return params


def reference_forward_f32(x, params):
    """Pure-f32 reference matching the PyTorch module exactly."""
    h = jnp.maximum(x @ params["w1"] + params["b1"], 0.0)
    h = jnp.maximum(h @ params["w2"] + params["b2"], 0.0)
    h = jnp.maximum(h @ params["w3"] + params["b3"], 0.0)
    return h @ params["w4"] + params["b4"]


def reference_forward_mixed(x, params, in_dtype=jnp.bfloat16):
    """Reference with the same bf16 cast on x/w1 the kernel uses (f32 accumulation)."""
    h = jnp.dot(x.astype(in_dtype), params["w1"].astype(in_dtype),
                preferred_element_type=jnp.float32)
    h = jnp.maximum(h + params["b1"], 0.0)
    h = jnp.maximum(h @ params["w2"] + params["b2"], 0.0)
    h = jnp.maximum(h @ params["w3"] + params["b3"], 0.0)
    return h @ params["w4"] + params["b4"]


if __name__ == "__main__":
    key = jax.random.PRNGKey(0)
    key, kx = jax.random.split(key)

    B = 8  # small test batch (production batches get tiled / pipelined automatically)
    x = jax.random.normal(kx, (B, 1024), jnp.float32)
    params = init_params(key)

    out = essay_scorer_head(x, params)
    out = jax.block_until_ready(out)
    assert out.shape == (B, 1), out.shape

    # Kernel math must match the same-precision reference tightly...
    ref_mixed = reference_forward_mixed(x, params)
    assert jnp.allclose(out, ref_mixed, atol=5e-3, rtol=5e-3), "mismatch vs mixed-precision reference"
    # ...and stay close to the original f32 PyTorch semantics (bf16 x/w1 rounding only).
    ref_f32 = reference_forward_f32(x, params)
    assert jnp.allclose(out, ref_f32, atol=5e-2, rtol=5e-2), "mismatch vs f32 reference"

    print("KERNEL_OK")
</pallas_src>

<mosaic_0001>
module attributes {stable_mosaic.version = 11 : i64} {
  func.func @_mlp_kernel(%arg0: i32, %arg1: memref<8x1024xf32, #tpu.memory_space<vmem>>, %arg2: memref<1024x128xbf16, #tpu.memory_space<vmem>>, %arg3: memref<1x128xf32, #tpu.memory_space<vmem>>, %arg4: memref<128x128xf32, #tpu.memory_space<vmem>>, %arg5: memref<1x128xf32, #tpu.memory_space<vmem>>, %arg6: memref<128x128xf32, #tpu.memory_space<vmem>>, %arg7: memref<1x128xf32, #tpu.memory_space<vmem>>, %arg8: memref<1x128xf32, #tpu.memory_space<vmem>>, %arg9: memref<1x1xf32, #tpu.memory_space<vmem>>, %arg10: memref<8x1xf32, #tpu.memory_space<vmem>>) attributes {dimension_semantics = [#tpu.dimension_semantics<parallel>], iteration_bounds = array<i64: 1>, scalar_prefetch = 0 : i64, scratch_operands = 0 : i64, tpu.core_type = #tpu.core_type<tc>, window_params = [{transform_indices = @transform_0, window_bounds = array<i64: 8, 1024>}, {pipeline_mode = #tpu.pipeline_mode<synchronous>, transform_indices = @transform_1, window_bounds = array<i64: 1024, 128>}, {pipeline_mode = #tpu.pipeline_mode<synchronous>, transform_indices = @transform_2, window_bounds = array<i64: 1, 128>}, {pipeline_mode = #tpu.pipeline_mode<synchronous>, transform_indices = @transform_3, window_bounds = array<i64: 128, 128>}, {pipeline_mode = #tpu.pipeline_mode<synchronous>, transform_indices = @transform_4, window_bounds = array<i64: 1, 128>}, {pipeline_mode = #tpu.pipeline_mode<synchronous>, transform_indices = @transform_5, window_bounds = array<i64: 128, 128>}, {pipeline_mode = #tpu.pipeline_mode<synchronous>, transform_indices = @transform_6, window_bounds = array<i64: 1, 128>}, {pipeline_mode = #tpu.pipeline_mode<synchronous>, transform_indices = @transform_7, window_bounds = array<i64: 1, 128>}, {pipeline_mode = #tpu.pipeline_mode<synchronous>, transform_indices = @transform_8, window_bounds = array<i64: 1, 1>}, {transform_indices = @transform_9, window_bounds = array<i64: 8, 1>}]} {
    %c0 = arith.constant 0 : index
    %c0_0 = arith.constant 0 : index
    %0 = vector.load %arg1[%c0, %c0_0] : memref<8x1024xf32, #tpu.memory_space<vmem>>, vector<8x1024xf32>
    %1 = arith.truncf %0 : vector<8x1024xf32> to vector<8x1024xbf16>
    %c0_1 = arith.constant 0 : index
    %c0_2 = arith.constant 0 : index
    %2 = vector.load %arg2[%c0_1, %c0_2] : memref<1024x128xbf16, #tpu.memory_space<vmem>>, vector<1024x128xbf16>
    %cst = arith.constant dense<0.000000e+00> : vector<8x128xf32>
    %3 = tpu.matmul %1, %2, %cst {dimension_numbers = #tpu.dot_dimension_numbers<[1], [0], [0], [1], [0, 0, 1, 1], [], []>} : vector<8x1024xbf16>, vector<1024x128xbf16>, vector<8x128xf32> -> vector<8x128xf32>
    %c0_3 = arith.constant 0 : index
    %c0_4 = arith.constant 0 : index
    %4 = vector.load %arg3[%c0_3, %c0_4] : memref<1x128xf32, #tpu.memory_space<vmem>>, vector<1x128xf32>
    %5 = vector.broadcast %4 : vector<1x128xf32> to vector<8x128xf32>
    %6 = arith.addf %3, %5 : vector<8x128xf32>
    %cst_5 = arith.constant 0.000000e+00 : f32
    %7 = vector.broadcast %cst_5 : f32 to vector<8x128xf32>
    %8 = arith.maximumf %6, %7 : vector<8x128xf32>
    %c0_6 = arith.constant 0 : index
    %c0_7 = arith.constant 0 : index
    %9 = vector.load %arg4[%c0_6, %c0_7] : memref<128x128xf32, #tpu.memory_space<vmem>>, vector<128x128xf32>
    %cst_8 = arith.constant dense<0.000000e+00> : vector<8x128xf32>
    %10 = tpu.matmul %8, %9, %cst_8 {dimension_numbers = #tpu.dot_dimension_numbers<[1], [0], [0], [1], [0, 0, 1, 1], [], []>} : vector<8x128xf32>, vector<128x128xf32>, vector<8x128xf32> -> vector<8x128xf32>
    %c0_9 = arith.constant 0 : index
    %c0_10 = arith.constant 0 : index
    %11 = vector.load %arg5[%c0_9, %c0_10] : memref<1x128xf32, #tpu.memory_space<vmem>>, vector<1x128xf32>
    %12 = vector.broadcast %11 : vector<1x128xf32> to vector<8x128xf32>
    %13 = arith.addf %10, %12 : vector<8x128xf32>
    %cst_11 = arith.constant 0.000000e+00 : f32
    %14 = vector.broadcast %cst_11 : f32 to vector<8x128xf32>
    %15 = arith.maximumf %13, %14 : vector<8x128xf32>
    %c0_12 = arith.constant 0 : index
    %c0_13 = arith.constant 0 : index
    %16 = vector.load %arg6[%c0_12, %c0_13] : memref<128x128xf32, #tpu.memory_space<vmem>>, vector<128x128xf32>
    %cst_14 = arith.constant dense<0.000000e+00> : vector<8x128xf32>
    %17 = tpu.matmul %15, %16, %cst_14 {dimension_numbers = #tpu.dot_dimension_numbers<[1], [0], [0], [1], [0, 0, 1, 1], [], []>} : vector<8x128xf32>, vector<128x128xf32>, vector<8x128xf32> -> vector<8x128xf32>
    %c0_15 = arith.constant 0 : index
    %c0_16 = arith.constant 0 : index
    %18 = vector.load %arg7[%c0_15, %c0_16] : memref<1x128xf32, #tpu.memory_space<vmem>>, vector<1x128xf32>
    %19 = vector.broadcast %18 : vector<1x128xf32> to vector<8x128xf32>
    %20 = arith.addf %17, %19 : vector<8x128xf32>
    %cst_17 = arith.constant 0.000000e+00 : f32
    %21 = vector.broadcast %cst_17 : f32 to vector<8x128xf32>
    %22 = arith.maximumf %20, %21 : vector<8x128xf32>
    %c0_18 = arith.constant 0 : index
    %c0_19 = arith.constant 0 : index
    %23 = vector.load %arg8[%c0_18, %c0_19] : memref<1x128xf32, #tpu.memory_space<vmem>>, vector<1x128xf32>
    %24 = vector.broadcast %23 : vector<1x128xf32> to vector<8x128xf32>
    %25 = arith.mulf %22, %24 : vector<8x128xf32>
    %cst_20 = arith.constant dense<0.000000e+00> : vector<8xf32>
    %26 = vector.multi_reduction <add>, %25, %cst_20 [1] : vector<8x128xf32> to vector<8xf32>
    %27 = vector.shape_cast %26 : vector<8xf32> to vector<8x1xf32>
    %c0_21 = arith.constant 0 : index
    %c0_22 = arith.constant 0 : index
    %28 = vector.load %arg9[%c0_21, %c0_22] : memref<1x1xf32, #tpu.memory_space<vmem>>, vector<1x1xf32>
    %29 = vector.broadcast %28 : vector<1x1xf32> to vector<8x1xf32>
    %30 = arith.addf %27, %29 : vector<8x1xf32>
    %c0_23 = arith.constant 0 : index
    %c0_24 = arith.constant 0 : index
    %31 = vector.load %arg10[%c0_23, %c0_24] : memref<8x1xf32, #tpu.memory_space<vmem>>, vector<8x1xf32>
    tpu.vector_store %arg10[%c0_23, %c0_24], %30 {strides = array<i32>} : memref<8x1xf32, #tpu.memory_space<vmem>>, vector<8x1xf32>,
    return
  }
  func.func @transform_0(%arg0: i32) -> (i32, i32) {
    %c0_i32 = arith.constant 0 : i32
    %c0_i32_0 = arith.constant 0 : i32
    return %arg0, %c0_i32 : i32, i32
  }
  func.func @transform_1(%arg0: i32) -> (i32, i32) {
    %c0_i32 = arith.constant 0 : i32
    %c0_i32_0 = arith.constant 0 : i32
    %c0_i32_1 = arith.constant 0 : i32
    return %c0_i32, %c0_i32_0 : i32, i32
  }
  func.func @transform_2(%arg0: i32) -> (i32, i32) {
    %c0_i32 = arith.constant 0 : i32
    %c0_i32_0 = arith.constant 0 : i32
    %c0_i32_1 = arith.constant 0 : i32
    return %c0_i32, %c0_i32_0 : i32, i32
  }
  func.func @transform_3(%arg0: i32) -> (i32, i32) {
    %c0_i32 = arith.constant 0 : i32
    %c0_i32_0 = arith.constant 0 : i32
    %c0_i32_1 = arith.constant 0 : i32
    return %c0_i32, %c0_i32_0 : i32, i32
  }
  func.func @transform_4(%arg0: i32) -> (i32, i32) {
    %c0_i32 = arith.constant 0 : i32
    %c0_i32_0 = arith.constant 0 : i32
    %c0_i32_1 = arith.constant 0 : i32
    return %c0_i32, %c0_i32_0 : i32, i32
  }
  func.func @transform_5(%arg0: i32) -> (i32, i32) {
    %c0_i32 = arith.constant 0 : i32
    %c0_i32_0 = arith.constant 0 : i32
    %c0_i32_1 = arith.constant 0 : i32
    return %c0_i32, %c0_i32_0 : i32, i32
  }
  func.func @transform_6(%arg0: i32) -> (i32, i32) {
    %c0_i32 = arith.constant 0 : i32
    %c0_i32_0 = arith.constant 0 : i32
    %c0_i32_1 = arith.constant 0 : i32
    return %c0_i32, %c0_i32_0 : i32, i32
  }
  func.func @transform_7(%arg0: i32) -> (i32, i32) {
    %c0_i32 = arith.constant 0 : i32
    %c0_i32_0 = arith.constant 0 : i32
    %c0_i32_1 = arith.constant 0 : i32
    return %c0_i32, %c0_i32_0 : i32, i32
  }
  func.func @transform_8(%arg0: i32) -> (i32, i32) {
    %c0_i32 = arith.constant 0 : i32
    %c0_i32_0 = arith.constant 0 : i32
    %c0_i32_1 = arith.constant 0 : i32
    return %c0_i32, %c0_i32_0 : i32, i32
  }
  func.func @transform_9(%arg0: i32) -> (i32, i32) {
    %c0_i32 = arith.constant 0 : i32
    %c0_i32_0 = arith.constant 0 : i32
    return %arg0, %c0_i32 : i32, i32
  }
}

</mosaic_0001>

<bundles_post_ra>
// kernel: tpu_custom_call.1
= control target key start
LH: loop header
LB: loop body
LE: loop exit
PB: predicated region body
PF: predicated region fallthrough
CT: control target
= control target key end

     0   :  { %s1544_s0 = inlined_call_operand.hbm [shape: f32[8,1024], index: 0, kind: input, shape index: {}]   ;;  %s1545_s1 = inlined_call_operand.hbm [shape: bf16[1024,128], index: 1, kind: input, shape index: {}]   ;;  %s1546_s2 = inlined_call_operand.vmem [shape: f32[1,128], index: 2, kind: input, shape index: {}]   ;;  %s1547_s3 = inlined_call_operand.hbm [shape: f32[128,128], index: 3, kind: input, shape index: {}]   ;;  %s1548_s4 = inlined_call_operand.vmem [shape: f32[1,128], index: 4, kind: input, shape index: {}]   ;;  %s1549_s5 = inlined_call_operand.hbm [shape: f32[128,128], index: 5, kind: input, shape index: {}]   ;;  %s1550_s6 = inlined_call_operand.vmem [shape: f32[1,128], index: 6, kind: input, shape index: {}]   ;;  %s1551_s7 = inlined_call_operand.vmem [shape: f32[1,128], index: 7, kind: input, shape index: {}]   ;;  %s1552_s8 = inlined_call_operand.<no memory space> [shape: f32[1,1], index: 8, kind: input, shape index: {}]   ;;  %s1553_s9 = inlined_call_operand.vmem [shape: f32[8,1], index: 9, kind: output, shape index: {}]  }
   0x1   :  { %v14_v0 = vstv %s1552_s8 }
   0x2   :  { %15 = vst [vmem:[#allocation2] sm:$0x1] %v14_v0 }
   0x3   :  { %16 = vsyncpa [#allocation4], 0 }
   0x4   :  { %17 = vsyncpa [#allocation6], 0 }
   0x5   :  { %18 = vsyncpa [#allocation9], 0  ;;  %s1420_s11 = smov [#allocation5]  }
   0x6   :  { %s34_s12 = sshll.u32 %s1420_s11, 4  ;;  %s35_s12 = int_to_ptr.vmem [resolvable:$true] %s34_s12 }
   0x7   :  { %s1342_s13 = scalar_lea.vmem %s35_s12, 8192  ;;  %p1347_p1 = scmp.lt.s32.totalorder %s35_s12, %s35_s12 }
   0x8   :  { %p1343_p0 = scmp.ne.s32.totalorder %s35_s12, %s1342_s13  ;;  %p1348_p2 = scmp.lt.s32.totalorder %s1342_s13, %s1342_s13 }
   0xa   :  { %p1349_p3 = por %p1348_p2, %p1347_p1 }
   0xc   :  { %p1350_p4 = pnand %p1349_p3, %p1343_p0 }
   0xe   :  { %1353 = shalt.err (!%p1350_p4)
}
   0xf   :  { %s1421_s14 = smov 64   ;;  %s1422_s15 = smov 4  }
  0x10   :  { %40 = dma.hbm_to_vmem [thread:$0]  %s1545_s1, 8192, %s35_s12, [#allocation6], %s1421_s14, %s1421_s14, %s1422_s15  }
  0x11   :  { %s1423_s8 = smov [#allocation3]   ;;  %s1424_s19 = smov [#allocation7]  }
  0x12   :  { %s25_s18 = sshll.u32 %s1423_s8, 4  ;;  %s48_s20 = sshll.u32 %s1424_s19, 4  ;;  %s26_s18 = int_to_ptr.vmem [resolvable:$true] %s25_s18  ;;  %s49_s20 = int_to_ptr.vmem [resolvable:$true] %s48_s20 }
  0x13   :  { %s1362_s21 = scalar_lea.vmem %s26_s18, 1024  ;;  %p1367_p6 = scmp.lt.s32.totalorder %s26_s18, %s26_s18 }
  0x14   :  { %p1363_p5 = scmp.ne.s32.totalorder %s26_s18, %s1362_s21  ;;  %p1368_p7 = scmp.lt.s32.totalorder %s1362_s21, %s1362_s21 }
  0x16   :  { %p1369_p8 = por %p1368_p7, %p1367_p6 }
  0x18   :  { %p1370_p9 = pnand %p1369_p8, %p1363_p5 }
  0x1a   :  { %1373 = shalt.err (!%p1370_p9)
}
  0x1b   :  { %28 = dma.hbm_to_vmem [thread:$0]  %s1544_s0, 1024, %s26_s18, [#allocation4]  }
  0x1c   :  { %s1382_s24 = scalar_lea.vmem %s49_s20, 2048  ;;  %p1387_p11 = scmp.lt.s32.totalorder %s49_s20, %s49_s20 }
  0x1d   :  { %p1383_p10 = scmp.ne.s32.totalorder %s49_s20, %s1382_s24  ;;  %p1388_p12 = scmp.lt.s32.totalorder %s1382_s24, %s1382_s24 }
  0x1f   :  { %p1389_p13 = por %p1388_p12, %p1387_p11 }
  0x21   :  { %p1390_p0 = pnand %p1389_p13, %p1383_p10 }
  0x23   :  { %1393 = shalt.err (!%p1390_p0)
}
  0x24   :  { %s1425_s1 = smov 128   ;;  %s1426_s25 = smov 8  }
  0x25   :  { %54 = dma.hbm_to_vmem [thread:$0]  %s1547_s3, 2048, %s49_s20, [#allocation6], %s1425_s1, %s1425_s1, %s1426_s25  }
  0x26   :  { %s1427_s28 = smov [#allocation8]  }
  0x27   :  { %s62_s29 = sshll.u32 %s1427_s28, 4  ;;  %s63_s29 = int_to_ptr.vmem [resolvable:$true] %s62_s29 }
  0x28   :  { %s1402_s30 = scalar_lea.vmem %s63_s29, 2048  ;;  %p1407_p2 = scmp.lt.s32.totalorder %s63_s29, %s63_s29 }
  0x29   :  { %p1403_p1 = scmp.ne.s32.totalorder %s63_s29, %s1402_s30  ;;  %p1408_p3 = scmp.lt.s32.totalorder %s1402_s30, %s1402_s30 }
  0x2b   :  { %p1409_p4 = por %p1408_p3, %p1407_p2 }
  0x2d   :  { %p1410_p5 = pnand %p1409_p4, %p1403_p1 }
  0x2f   :  { %1413 = shalt.err (!%p1410_p5)
}
  0x30   :  { %68 = dma.hbm_to_vmem [thread:$0]  %s1549_s5, 2048, %s63_s29, [#allocation9], %s1425_s1, %s1425_s1, %s1426_s25  }
  0x31   :  { %1414 = dma.done.wait [#allocation4], 1024  }
  0x32   :  { %1415 = vsyncadd [#allocation4], 4294966272 }
  0x33   :  { %1416 = dma.done.wait [#allocation6], 10240  }
  0x34   :  { %1417 = vsyncadd [#allocation6], 4294957056 }
  0x35   :  { %1418 = dma.done.wait [#allocation9], 2048  }
  0x36   :  { %1419 = vsyncadd [#allocation9], 4294965248  ;;  %v1270_v1 = vld [vmem:[#allocation5 + $0x78] sm:$0xff]   ;;  %v1274_v5 = vld [vmem:[#allocation5 + $0x70] sm:$0xff]   ;;  %vm1429_vm0 = vmmov 0   ;;  %vm990_vm1 = vcmask 7168  }
  0x37   :  { %v1271_v2 = vld [vmem:[#allocation5 + $0xf8] sm:$0xff]   ;;  %1068 = vmatprep.subr.bf16.mxu0 %v1270_v1  ;;  %v1275_v6 = vld [vmem:[#allocation5 + $0xf0] sm:$0xff]   ;;  %v1278_v9 = vld [vmem:[#allocation5 + $0x68] sm:$0xff]  }
  0x38   :  { %v1272_v3 = vld [vmem:[#allocation5 + $0x38] sm:$0xff]   ;;  %1090 = vmatprep.subr.bf16.mxu1 %v1271_v2  ;;  %v1276_v7 = vld [vmem:[#allocation5 + $0x30] sm:$0xff]   ;;  %v1279_v10 = vld [vmem:[#allocation5 + $0xe8] sm:$0xff]  }
  0x39   :  { %v1273_v4 = vld [vmem:[#allocation5 + $0xb8] sm:$0xff]   ;;  %1069 = vmatpush3.bf16.msra.mxu0 %v1272_v3  ;;  %v1277_v8 = vld [vmem:[#allocation5 + $0xb0] sm:$0xff]   ;;  %v1280_v11 = vld [vmem:[#allocation5 + $0x28] sm:$0xff]  }
  0x3a   :  { %1091 = vmatpush3.bf16.msra.mxu1 %v1273_v4  ;;  %1070 = vmatprep.subr.bf16.mxu0 %v1274_v5  ;;  %v1281_v12 = vld [vmem:[#allocation5 + $0xa8] sm:$0xff]   ;;  %v1282_v13 = vld [vmem:[#allocation5 + $0x60] sm:$0xff]   ;;  %v1286_v17 = vld [vmem:[#allocation5 + $0x58] sm:$0xff]  }
  0x3b   :  { %1092 = vmatprep.subr.bf16.mxu1 %v1275_v6  ;;  %v1283_v14 = vld [vmem:[#allocation5 + $0xe0] sm:$0xff]   ;;  %v1287_v18 = vld [vmem:[#allocation5 + $0xd8] sm:$0xff]   ;;  %v1290_v21 = vld [vmem:[#allocation5 + $0x50] sm:$0xff]  }
  0x3c   :  { %v1284_v15 = vld [vmem:[#allocation5 + $0x20] sm:$0xff]   ;;  %v1288_v19 = vld [vmem:[#allocation5 + $0x18] sm:$0xff]   ;;  %v1291_v22 = vld [vmem:[#allocation5 + $0xd0] sm:$0xff]  }
  0x3d   :  { %1071 = vmatpush3.bf16.msra.mxu0 %v1276_v7  ;;  %v1285_v16 = vld [vmem:[#allocation5 + $0xa0] sm:$0xff]   ;;  %v1289_v20 = vld [vmem:[#allocation5 + $0x98] sm:$0xff]   ;;  %v1292_v23 = vld [vmem:[#allocation5 + $0x10] sm:$0xff]  }
  0x3e   :  { %1093 = vmatpush3.bf16.msra.mxu1 %v1277_v8  ;;  %1072 = vmatprep.subr.bf16.mxu0 %v1278_v9  ;;  %v1293_v24 = vld [vmem:[#allocation5 + $0x90] sm:$0xff]   ;;  %v1294_v25 = vld [vmem:[#allocation5 + $0x48] sm:$0xff]   ;;  %v1298_v29 = vld [vmem:[#allocation5 + $0x40] sm:$0xff]  }
  0x3f   :  { %1094 = vmatprep.subr.bf16.mxu1 %v1279_v10  ;;  %v1295_v26 = vld [vmem:[#allocation5 + $0xc8] sm:$0xff]   ;;  %v1299_v30 = vld [vmem:[#allocation5 + $0xc0] sm:$0xff]   ;;  %v91_v34 = vld [vmem:[#allocation3 + $0x18] sm:$0xff] }
  0x40   :  { %v1296_v27 = vld [vmem:[#allocation5 + $0x8] sm:$0xff]   ;;  %v1300_v31 = vld [vmem:[#allocation5] sm:$0xff]   ;;  %v99_v37 = vpack.c.bf16 %v91_v34, %v91_v34  ;;  %v90_v39 = vld [vmem:[#allocation3 + $0x10] sm:$0xff] }
  0x41   :  { %1073 = vmatpush3.bf16.msra.mxu0 %v1280_v11  ;;  %v1297_v28 = vld [vmem:[#allocation5 + $0x88] sm:$0xff]   ;;  %v1301_v32 = vld [vmem:[#allocation5 + $0x80] sm:$0xff]   ;;  %v98_v40 = vpack.c.bf16 %v90_v39, %v90_v39  ;;  %v1302_v41 = vld [vmem:[#allocation5 + $0x178] sm:$0xff]  }
  0x42   :  { %1095 = vmatpush3.bf16.msra.mxu1 %v1281_v12  ;;  %1074 = vmatprep.subr.bf16.mxu0 %v1282_v13  ;;  %v89_v33 = vld [vmem:[#allocation3 + $0x8] sm:$0xff]  ;;  %v88_v35 = vld [vmem:[#allocation3] sm:$0xff]  ;;  %v1303_v42 = vld [vmem:[#allocation5 + $0x1f8] sm:$0xff]  }
  0x43   :  { %1096 = vmatprep.subr.bf16.mxu1 %v1283_v14  ;;  %v97_v36 = vpack.c.bf16 %v89_v33, %v89_v33  ;;  %v96_v38 = vpack.c.bf16 %v88_v35, %v88_v35  ;;  %695 = vmatprep.mubr.bf16.mxu1 %v99_v37  ;;  %v1304_v43 = vld [vmem:[#allocation5 + $0x138] sm:$0xff]   ;;  %v1306_v45 = vld [vmem:[#allocation5 + $0x170] sm:$0xff]   ;;  %v1310_v49 = vld [vmem:[#allocation5 + $0x168] sm:$0xff]  }
  0x44   :  { %v1305_v44 = vld [vmem:[#allocation5 + $0x1b8] sm:$0xff]   ;;  %v1307_v46 = vld [vmem:[#allocation5 + $0x1f0] sm:$0xff]   ;;  %v1311_v50 = vld [vmem:[#allocation5 + $0x1e8] sm:$0xff]  }
  0x45   :  { %1075 = vmatpush3.bf16.msra.mxu0 %v1284_v15  ;;  %655 = vmatprep.mubr.bf16.mxu0 %v97_v36  ;;  %v1308_v47 = vld [vmem:[#allocation5 + $0x130] sm:$0xff]   ;;  %v1312_v51 = vld [vmem:[#allocation5 + $0x128] sm:$0xff]   ;;  %v1314_v53 = vld [vmem:[#allocation5 + $0x160] sm:$0xff]  }
  0x46   :  { %1097 = vmatpush3.bf16.msra.mxu1 %v1285_v16  ;;  %1076 = vmatprep.subr.bf16.mxu0 %v1286_v17  ;;  %v1309_v48 = vld [vmem:[#allocation5 + $0x1b0] sm:$0xff]   ;;  %v1313_v52 = vld [vmem:[#allocation5 + $0x1a8] sm:$0xff]   ;;  %v1315_v54 = vld [vmem:[#allocation5 + $0x1e0] sm:$0xff]  }
  0x47   :  { %1098 = vmatprep.subr.bf16.mxu1 %v1287_v18  ;;  %v1316_v55 = vld [vmem:[#allocation5 + $0x120] sm:$0xff]   ;;  %v1318_v57 = vld [vmem:[#allocation5 + $0x158] sm:$0xff]   ;;  %v1322_v61 = vld [vmem:[#allocation5 + $0x150] sm:$0xff]   ;;  %v1428_v18 = vmov 0.0  }
  0x48   :  { %v1317_v56 = vld [vmem:[#allocation5 + $0x1a0] sm:$0xff]   ;;  %v1319_v58 = vld [vmem:[#allocation5 + $0x1d8] sm:$0xff]   ;;  %v1323_v62 = vld [vmem:[#allocation5 + $0x1d0] sm:$0xff]  }
  0x49   :  { %1077 = vmatpush3.bf16.msra.mxu0 %v1288_v19  ;;  %v1320_v59 = vld [vmem:[#allocation5 + $0x118] sm:$0xff]   ;;  %v1324_v63 = vld [vmem:[#allocation5 + $0x110] sm:$0xff]   ;;  %v1326_v1 = vld [vmem:[#allocation5 + $0x148] sm:$0xff]  }
  0x4a   :  { %1099 = vmatpush3.bf16.msra.mxu1 %v1289_v20  ;;  %1078 = vmatprep.subr.bf16.mxu0 %v1290_v21  ;;  %v1321_v60 = vld [vmem:[#allocation5 + $0x198] sm:$0xff]   ;;  %v1325_v0 = vld [vmem:[#allocation5 + $0x190] sm:$0xff]   ;;  %v1327_v2 = vld [vmem:[#allocation5 + $0x1c8] sm:$0xff]  }
  0x4b   :  { %1100 = vmatprep.subr.bf16.mxu1 %v1291_v22  ;;  %v1328_v3 = vld [vmem:[#allocation5 + $0x108] sm:$0xff]   ;;  %v1330_v5 = vld [vmem:[#allocation5 + $0x140] sm:$0xff]   ;;  %v95_v10 = vld [vmem:[#allocation3 + $0x38] sm:$0xff] }
  0x4c   :  { %v1329_v4 = vld [vmem:[#allocation5 + $0x188] sm:$0xff]   ;;  %v1331_v6 = vld [vmem:[#allocation5 + $0x1c0] sm:$0xff]   ;;  %v103_v12 = vpack.c.bf16 %v95_v10, %v95_v10  ;;  %v94_v14 = vld [vmem:[#allocation3 + $0x30] sm:$0xff] }
  0x4d   :  { %1079 = vmatpush3.bf16.msra.mxu0 %v1292_v23  ;;  %v1332_v7 = vld [vmem:[#allocation5 + $0x100] sm:$0xff]   ;;  %v93_v9 = vld [vmem:[#allocation3 + $0x28] sm:$0xff]  ;;  %v102_v16 = vpack.c.bf16 %v94_v14, %v94_v14  ;;  %v799_v17 = vld [vmem:[#allocation7 + $0x78] sm:$0xff] }
  0x4e   :  { %1101 = vmatpush3.bf16.msra.mxu1 %v1293_v24  ;;  %1080 = vmatprep.subr.bf16.mxu0 %v1294_v25  ;;  %v1333_v8 = vld [vmem:[#allocation5 + $0x180] sm:$0xff]   ;;  %v101_v11 = vpack.c.bf16 %v93_v9, %v93_v9  ;;  %v798_v19 = vld [vmem:[#allocation7 + $0x70] sm:$0xff]  ;;  %v797_v20 = vld [vmem:[#allocation7 + $0x68] sm:$0xff] }
  0x4f   :  { %1102 = vmatprep.subr.bf16.mxu1 %v1295_v26  ;;  %v92_v13 = vld [vmem:[#allocation3 + $0x20] sm:$0xff]  ;;  %v795_v22 = vld [vmem:[#allocation7 + $0x58] sm:$0xff]  ;;  %v794_v23 = vld [vmem:[#allocation7 + $0x50] sm:$0xff] }
  0x50   :  { %v100_v15 = vpack.c.bf16 %v92_v13, %v92_v13  ;;  %v796_v21 = vld [vmem:[#allocation7 + $0x60] sm:$0xff]  ;;  %v793_v24 = vld [vmem:[#allocation7 + $0x48] sm:$0xff]  ;;  %v791_v26 = vld [vmem:[#allocation7 + $0x38] sm:$0xff] }
  0x51   :  { %1081 = vmatpush3.bf16.msra.mxu0 %v1296_v27  ;;  %v792_v25 = vld [vmem:[#allocation7 + $0x40] sm:$0xff]  ;;  %v790_v27 = vld [vmem:[#allocation7 + $0x30] sm:$0xff]  ;;  %v893_v34 = vld [vmem:[#allocation8 + $0x78] sm:$0xff] }
  0x52   :  { %1103 = vmatpush3.bf16.msra.mxu1 %v1297_v28  ;;  %1082 = vmatprep.subr.bf16.mxu0 %v1298_v29  ;;  %v789_v28 = vld [vmem:[#allocation7 + $0x28] sm:$0xff]  ;;  %v788_v29 = vld [vmem:[#allocation7 + $0x20] sm:$0xff]  ;;  %v892_v35 = vld [vmem:[#allocation8 + $0x70] sm:$0xff] }
  0x53   :  { %1104 = vmatprep.subr.bf16.mxu1 %v1299_v30  ;;  %v787_v30 = vld [vmem:[#allocation7 + $0x18] sm:$0xff]  ;;  %v784_v33 = vld [vmem:[#allocation7] sm:$0xff]  ;;  %v891_v36 = vld [vmem:[#allocation8 + $0x68] sm:$0xff] }
  0x54   :  { %v890_v37 = vld [vmem:[#allocation8 + $0x60] sm:$0xff]  ;;  %v888_v39 = vld [vmem:[#allocation8 + $0x50] sm:$0xff]  ;;  %v879_v10 = vld [vmem:[#allocation8 + $0x8] sm:$0xff] }
  0x55   :  { %1083 = vmatpush3.bf16.msra.mxu0 %v1300_v31  ;;  %v786_v31 = vld [vmem:[#allocation7 + $0x10] sm:$0xff] }
  0x56   :  { %1105 = vmatpush3.bf16.msra.mxu1 %v1301_v32  ;;  %1112 = vmatprep.subr.bf16.mxu0 %v1302_v41  ;;  %v785_v32 = vld [vmem:[#allocation7 + $0x8] sm:$0xff]  ;;  %v886_v41 = vld [vmem:[#allocation8 + $0x40] sm:$0xff]  ;;  %v880_v9 = vld [vmem:[#allocation8 + $0x10] sm:$0xff] }
  0x57   :  { %1134 = vmatprep.subr.bf16.mxu1 %v1303_v42  ;;  %v885_v42 = vld [vmem:[#allocation8 + $0x38] sm:$0xff] }
  0x58   :  { %656 = vmatmul.mubr.bf16.vlgmr.msra.gmra.mxu0 %v96_v38  ;;  %v889_v38 = vld [vmem:[#allocation8 + $0x58] sm:$0xff] }
  0x59   :  { %696 = vmatmul.mubr.bf16.vlgmr.msra.gmra.mxu1 %v98_v40  ;;  %1113 = vmatpush3.bf16.msra.mxu0 %v1304_v43  ;;  %v887_v40 = vld [vmem:[#allocation8 + $0x48] sm:$0xff]  ;;  %v884_v43 = vld [vmem:[#allocation8 + $0x30] sm:$0xff] }
  0x5a   :  { %1135 = vmatpush3.bf16.msra.mxu1 %v1305_v44  ;;  %1114 = vmatprep.subr.bf16.mxu0 %v1306_v45  ;;  %v883_v44 = vld [vmem:[#allocation8 + $0x28] sm:$0xff]  ;;  %v882_v45 = vld [vmem:[#allocation8 + $0x20] sm:$0xff] }
  0x5b   :  { %1136 = vmatprep.subr.bf16.mxu1 %v1307_v46  ;;  %735 = vmatprep.mubr.bf16.mxu0 %v101_v11  ;;  %v881_v46 = vld [vmem:[#allocation8 + $0x18] sm:$0xff]  ;;  %v878_v11 = vld [vmem:[#allocation8] sm:$0xff] }
  0x5c   :  { %775 = vmatprep.mubr.bf16.mxu1 %v103_v12  ;;  %v1064_v12 = vld [vmem:[%s1548_s4] ss:$0 sm:$0xff] }
  0x5d   :  { %1115 = vmatpush3.bf16.msra.mxu0 %v1308_v47 }
  0x5e   :  { %1137 = vmatpush3.bf16.msra.mxu1 %v1309_v48  ;;  %1116 = vmatprep.subr.bf16.mxu0 %v1310_v49 }
  0x5f   :  { %1138 = vmatprep.subr.bf16.mxu1 %v1311_v50 }
  0x61   :  { %1117 = vmatpush3.bf16.msra.mxu0 %v1312_v51 }
  0x62   :  { %1139 = vmatpush3.bf16.msra.mxu1 %v1313_v52  ;;  %1118 = vmatprep.subr.bf16.mxu0 %v1314_v53 }
  0x63   :  { %1140 = vmatprep.subr.bf16.mxu1 %v1315_v54 }
  0x65   :  { %1119 = vmatpush3.bf16.msra.mxu0 %v1316_v55 }
  0x66   :  { %1141 = vmatpush3.bf16.msra.mxu1 %v1317_v56  ;;  %1120 = vmatprep.subr.bf16.mxu0 %v1318_v57  ;;  %v999_v56 = vld [vmem:[%s1546_s2] ss:$0 sm:$0xff] }
  0x67   :  { %1142 = vmatprep.subr.bf16.mxu1 %v1319_v58 }
  0x69   :  { %1121 = vmatpush3.bf16.msra.mxu0 %v1320_v59 }
  0x6a   :  { %1143 = vmatpush3.bf16.msra.mxu1 %v1321_v60  ;;  %1122 = vmatprep.subr.bf16.mxu0 %v1322_v61 }
  0x6b   :  { %1144 = vmatprep.subr.bf16.mxu1 %v1323_v62 }
  0x6d   :  { %1123 = vmatpush3.bf16.msra.mxu0 %v1324_v63 }
  0x6e   :  { %1145 = vmatpush3.bf16.msra.mxu1 %v1325_v0  ;;  %1124 = vmatprep.subr.bf16.mxu0 %v1326_v1 }
  0x6f   :  { %1146 = vmatprep.subr.bf16.mxu1 %v1327_v2 }
  0x71   :  { %1125 = vmatpush3.bf16.msra.mxu0 %v1328_v3 }
  0x72   :  { %1147 = vmatpush3.bf16.msra.mxu1 %v1329_v4  ;;  %1126 = vmatprep.subr.bf16.mxu0 %v1330_v5 }
  0x73   :  { %1148 = vmatprep.subr.bf16.mxu1 %v1331_v6 }
  0x75   :  { %1127 = vmatpush3.bf16.msra.mxu0 %v1332_v7 }
  0x76   :  { %1149 = vmatpush3.bf16.msra.mxu1 %v1333_v8  ;;  %1190 = vmatprep.subr.mxu0 %v1428_v18 }
  0x77   :  { %1225 = vmatprep.subr.mxu1 %v1428_v18 }
  0x78   :  { %736 = vmatmul.mubr.bf16.vlgmr.msra.gmra.mxu0 %v100_v15 }
  0x79   :  { %776 = vmatmul.mubr.bf16.vlgmr.msra.gmra.mxu1 %v102_v16  ;;  %1191 = vmatpush3.msra.mxu0 %v799_v17  ;;  %v1065_v17 = vld [vmem:[%s1550_s6] ss:$0 sm:$0xff] }
  0x7a   :  { %1192 = vmatprep.subr.mxu0 %v1428_v18  ;;  %1222 = vmatprep.mubr.msk.f32.mxu0 %vm1429_vm0, %v1428_v18 }
  0x7b   :  { %1193 = vmatpush3.msra.mxu0 %v798_v19  ;;  %1257 = vmatprep.mubr.msk.f32.mxu1 %vm1429_vm0, %v1428_v18 }
  0x7c   :  { %1194 = vmatprep.subr.mxu0 %v1428_v18  ;;  %1226 = vmatpush3.msra.mxu1 %v893_v34 }
  0x7d   :  { %1195 = vmatpush3.msra.mxu0 %v797_v20  ;;  %1227 = vmatprep.subr.mxu1 %v1428_v18 }
  0x7e   :  { %1196 = vmatprep.subr.mxu0 %v1428_v18  ;;  %1228 = vmatpush3.msra.mxu1 %v892_v35 }
  0x7f   :  { %1197 = vmatpush3.msra.mxu0 %v796_v21  ;;  %1229 = vmatprep.subr.mxu1 %v1428_v18 }
  0x80   :  { %1198 = vmatprep.subr.mxu0 %v1428_v18  ;;  %1230 = vmatpush3.msra.mxu1 %v891_v36 }
  0x81   :  { %1199 = vmatpush3.msra.mxu0 %v795_v22  ;;  %1231 = vmatprep.subr.mxu1 %v1428_v18 }
  0x82   :  { %1200 = vmatprep.subr.mxu0 %v1428_v18  ;;  %1232 = vmatpush3.msra.mxu1 %v890_v37 }
  0x83   :  { %1201 = vmatpush3.msra.mxu0 %v794_v23  ;;  %1233 = vmatprep.subr.mxu1 %v1428_v18 }
  0x84   :  { %1202 = vmatprep.subr.mxu0 %v1428_v18  ;;  %1234 = vmatpush3.msra.mxu1 %v889_v38 }
  0x85   :  { %1203 = vmatpush3.msra.mxu0 %v793_v24  ;;  %1235 = vmatprep.subr.mxu1 %v1428_v18  ;;  %v1067_v24 = vld [vmem:[#allocation2] ss:$0 sm:$0xff] }
  0x86   :  { %1204 = vmatprep.subr.mxu0 %v1428_v18  ;;  %1236 = vmatpush3.msra.mxu1 %v888_v39 }
  0x87   :  { %1205 = vmatpush3.msra.mxu0 %v792_v25  ;;  %1237 = vmatprep.subr.mxu1 %v1428_v18 }
  0x88   :  { %1206 = vmatprep.subr.mxu0 %v1428_v18  ;;  %1238 = vmatpush3.msra.mxu1 %v887_v40 }
  0x89   :  { %1207 = vmatpush3.msra.mxu0 %v791_v26  ;;  %1239 = vmatprep.subr.mxu1 %v1428_v18 }
  0x8a   :  { %1208 = vmatprep.subr.mxu0 %v1428_v18  ;;  %1240 = vmatpush3.msra.mxu1 %v886_v41 }
  0x8b   :  { %1209 = vmatpush3.msra.mxu0 %v790_v27  ;;  %1241 = vmatprep.subr.mxu1 %v1428_v18 }
  0x8c   :  { %1210 = vmatprep.subr.mxu0 %v1428_v18  ;;  %1242 = vmatpush3.msra.mxu1 %v885_v42 }
  0x8d   :  { %1211 = vmatpush3.msra.mxu0 %v789_v28  ;;  %1243 = vmatprep.subr.mxu1 %v1428_v18 }
  0x8e   :  { %1212 = vmatprep.subr.mxu0 %v1428_v18  ;;  %1244 = vmatpush3.msra.mxu1 %v884_v43 }
  0x8f   :  { %1213 = vmatpush3.msra.mxu0 %v788_v29  ;;  %1245 = vmatprep.subr.mxu1 %v1428_v18 }
  0x90   :  { %1214 = vmatprep.subr.mxu0 %v1428_v18  ;;  %1246 = vmatpush3.msra.mxu1 %v883_v44 }
  0x91   :  { %1215 = vmatpush3.msra.mxu0 %v787_v30  ;;  %1247 = vmatprep.subr.mxu1 %v1428_v18 }
  0x92   :  { %1216 = vmatprep.subr.mxu0 %v1428_v18  ;;  %1248 = vmatpush3.msra.mxu1 %v882_v45 }
  0x93   :  { %1217 = vmatpush3.msra.mxu0 %v786_v31  ;;  %1249 = vmatprep.subr.mxu1 %v1428_v18 }
  0x94   :  { %1218 = vmatprep.subr.mxu0 %v1428_v18  ;;  %1250 = vmatpush3.msra.mxu1 %v881_v46 }
  0x95   :  { %1219 = vmatpush3.msra.mxu0 %v785_v32  ;;  %1251 = vmatprep.subr.mxu1 %v1428_v18 }
  0x96   :  { %1220 = vmatprep.subr.mxu0 %v1428_v18  ;;  %1252 = vmatpush3.msra.mxu1 %v880_v9 }
  0x97   :  { %1221 = vmatpush3.msra.mxu0 %v784_v33  ;;  %1253 = vmatprep.subr.mxu1 %v1428_v18 }
  0x98   :  { %1254 = vmatpush3.msra.mxu1 %v879_v10 }
  0x99   :  { %1255 = vmatprep.subr.mxu1 %v1428_v18  ;;  %v1066_v18 = vld [vmem:[%s1551_s7] ss:$0 sm:$0xff] }
  0x9a   :  { %1256 = vmatpush3.msra.mxu1 %v878_v11 }
 0x118   :  { %v1084_v47 = vpop.f32.mrf.mxu0 }
 0x119   :  { %v1106_v48 = vpop.f32.mrf.mxu1 }
 0x11a   :  { %v1085_v49 = vpop.f32.mrf.mxu0 }
 0x11b   :  { %v1107_v50 = vpop.f32.mrf.mxu1  ;;  %v1086_v55 = vadd.f32 %v1085_v49, %v1084_v47 }
 0x11c   :  { %v1087_v51 = vpop.f32.mrf.mxu0  ;;  %v1108_v58 = vadd.f32 %v1107_v50, %v1106_v48 }
 0x11d   :  { %v1109_v52 = vpop.f32.mrf.mxu1  ;;  %v658_v57 = vadd.f32 %v1086_v55, %v999_v56 }
 0x11e   :  { %v1088_v53 = vpop.f32.mrf.mxu0 }
 0x11f   :  { %v1110_v54 = vpop.f32.mrf.mxu1  ;;  %v698_v62 = vadd.f32 %v1108_v58, %v658_v57 }
 0x138   :  { %v1128_v59 = vpop.f32.mrf.mxu0 }
 0x139   :  { %v1150_v60 = vpop.f32.mrf.mxu1 }
 0x13a   :  { %v1129_v61 = vpop.f32.mrf.mxu0 }
 0x13b   :  { %v1130_v63 = vadd.f32 %v1129_v61, %v1128_v59  ;;  %v1151_v0 = vpop.f32.mrf.mxu1 }
 0x13c   :  { %v1131_v1 = vpop.f32.mrf.mxu0  ;;  %v1152_v3 = vadd.f32 %v1151_v0, %v1150_v60 }
 0x13d   :  { %v738_v2 = vadd.f32 %v1130_v63, %v698_v62  ;;  %v1153_v4 = vpop.f32.mrf.mxu1 }
 0x13e   :  { %v1132_v5 = vpop.f32.mrf.mxu0 }
 0x13f   :  { %v778_v6 = vadd.f32 %v1152_v3, %v738_v2  ;;  %v1154_v7 = vpop.f32.mrf.mxu1 }
 0x141   :  { %v783_v8 = vmax.f32 %v778_v6, 0.0 }
 0x143   :  { %1223 = vmatmul.mubr.f32.vlgmr.msra.gmra.mxu0 %v783_v8 }
 0x203   :  { %v873_v13 = vpop.f32.mrf.mxu0 }
 0x204   :  { %v874_v14 = vadd.f32 %v1064_v12, %v873_v13 }
 0x205   :  { %v1224_v15 = vpop.f32.mrf.mxu0 }
 0x206   :  { %v877_v16 = vmax.f32 %v874_v14, 0.0 }
 0x208   :  { %1258 = vmatmul.mubr.f32.vlgmr.msra.gmra.mxu1 %v877_v16 }
 0x2c8   :  { %v967_v19 = vpop.f32.mrf.mxu1 }
 0x2c9   :  { %v968_v20 = vadd.f32 %v1065_v17, %v967_v19 }
 0x2ca   :  { %v1259_v21 = vpop.f32.mrf.mxu1 }
 0x2cb   :  { %v971_v22 = vmax.f32 %v968_v20, 0.0 }
 0x2cd   :  { %v979_v23 = vmul.f32 %v1066_v18, %v971_v22 }
 0x2cf   :  { %980 = vadd.xlane.f32.xlu0 %v979_v23 }
 0x358   :  { %v981_v25 = vpop.xlane.xlu0 %980 }
 0x359   :  { %v989_v26 = vadd.f32 %v1067_v24, %v981_v25 }
 0x35b   :  { %991 = vst.msk [vmem:[%s1553_s9] sm:$0xff] %vm990_vm1, %v989_v26 }
 0x35c   :  { %996 = vsyncpa [#allocation4], 1 }
 0x35d   :  { %997 = vsyncpa [#allocation6], 1 }
 0x35e   :  { %998 = vsyncpa [#allocation9], 1 }

</bundles_post_ra>
